<compile_context>
chip_gen: v5e
topology: v5e:2x2
jax: 0.10.0
libtpu: 0.0.40
codegen_flags: <defaults>
</compile_context>

<pallas_src>
import jax
import jax.numpy as jnp
from jax.experimental import pallas as pl
from jax.experimental.pallas import tpu as pltpu


def _encoder_kernel(x_ref, w1_ref, b1_ref, w2_ref, b2_ref, out_ref):
    # x_ref:   (BM, D_in)  f32   -- batch tile; bf16 cast done here on the VPU
    # w1_ref:  (D_in, H)   bf16  -- VMEM-resident across grid steps
    # b1_ref:  (1, H)      f32   -- resident
    # w2_ref:  (H, 2*Z)    bf16  -- fused [mu | sigma] head, resident
    # b2_ref:  (1, 2*Z)    f32   -- resident
    # out_ref: (BM, 2*Z)         -- fused [mu | sigma]
    x = x_ref[...].astype(w1_ref.dtype)  # in-kernel cast: VPU filler under DMA
    h = jnp.tanh(
        jnp.dot(x, w1_ref[...], preferred_element_type=jnp.float32)
        + b1_ref[...]
    )
    out = (
        jnp.dot(h.astype(w2_ref.dtype), w2_ref[...],
                preferred_element_type=jnp.float32)
        + b2_ref[...]
    )
    out_ref[...] = out.astype(out_ref.dtype)


def prepare_params(params, *, matmul_dtype=jnp.bfloat16):
    """One-time glue from PyTorch (out, in) layout to kernel layout.

    Done once (not per forward call):
      - transpose to (in, out) so the kernel does plain [M,K]x[K,N] matmuls
      - fuse mu/sigma heads into a single (H, 2*Z) weight / (1, 2*Z) bias
      - cast matmul weights to bf16 (accumulation stays f32 in the kernel)
    """
    w1 = params["w1"].T.astype(matmul_dtype)                         # (D_in, H)
    b1 = params["b1"].reshape(1, -1).astype(jnp.float32)             # (1, H)
    w2 = jnp.concatenate(
        [params["wmu"].T, params["wsigma"].T], axis=1
    ).astype(matmul_dtype)                                           # (H, 2Z)
    b2 = jnp.concatenate(
        [params["bmu"], params["bsigma"]], axis=0
    ).reshape(1, -1).astype(jnp.float32)                             # (1, 2Z)
    return {"w1": w1, "b1": b1, "w2": w2, "b2": b2}


def _round_up(n, m):
    return ((n + m - 1) // m) * m


# Rows per batch tile (cap). At these feature widths an 8192-row tile moves
# ~2 MiB of x (f32) + ~1 MiB of fused output per step, which amortizes the
# ~0.35 us per-grid-step pipeline overhead while the double-buffered VMEM
# footprint (~6-7 MiB) stays well under the default scoped limit on
# v5e (16 MiB) and v6e/v7x (32 MiB).
_BM_CAP = 8192


def _pick_block_m(batch):
    b8 = _round_up(batch, 8)
    if b8 <= 16:
        return b8  # too small to split; single step
    # Keep >= 2 grid steps so the "parallel" batch axis can shard across both
    # TensorCores on v7x, while making each tile as large as possible.
    half = _round_up(-(-b8 // 2), 8)
    return min(_BM_CAP, half)


def encoder_forward_fused(x, prepared, *, block_m=None, out_dtype=jnp.float32):
    """Returns the fused (B, 2*Z) [mu | sigma] slab.

    Preferred entry point inside a larger jitted model: consume the fused
    layout (or slice at the consumer) so XLA can fuse the slice into the next
    op instead of materializing an extra HBM pass here.
    """
    B, d_in = x.shape
    h_dim = prepared["w1"].shape[1]
    two_z = prepared["w2"].shape[1]

    bm = _round_up(int(block_m), 8) if block_m is not None else _pick_block_m(B)
    b_pad = _round_up(max(B, bm), bm)       # pad batch to a multiple of the tile
    if b_pad != B:
        x = jnp.pad(x, ((0, b_pad - B), (0, 0)))
    grid = (b_pad // bm,)

    out_dtype = jnp.dtype(out_dtype)
    cost = pl.CostEstimate(
        flops=2 * b_pad * (d_in * h_dim + h_dim * two_z),
        transcendentals=b_pad * h_dim,
        bytes_accessed=(
            b_pad * d_in * x.dtype.itemsize
            + b_pad * two_z * out_dtype.itemsize
            + sum(int(v.size) * v.dtype.itemsize for v in prepared.values())
        ),
    )

    fused = pl.pallas_call(
        _encoder_kernel,
        out_shape=jax.ShapeDtypeStruct((b_pad, two_z), out_dtype),
        grid_spec=pltpu.PrefetchScalarGridSpec(
            num_scalar_prefetch=0,
            grid=grid,
            in_specs=[
                pl.BlockSpec((bm, d_in), lambda i: (i, 0)),      # x: batch-tiled, f32
                pl.BlockSpec((d_in, h_dim), lambda i: (0, 0)),   # w1: resident
                pl.BlockSpec((1, h_dim), lambda i: (0, 0)),      # b1: resident
                pl.BlockSpec((h_dim, two_z), lambda i: (0, 0)),  # w2: resident
                pl.BlockSpec((1, two_z), lambda i: (0, 0)),      # b2: resident
            ],
            out_specs=pl.BlockSpec((bm, two_z), lambda i: (i, 0)),
        ),
        compiler_params=pltpu.CompilerParams(
            dimension_semantics=("parallel",),   # megacore-shard batch tiles
        ),
        cost_estimate=cost,
    )(x, prepared["w1"], prepared["b1"], prepared["w2"], prepared["b2"])

    if b_pad != B:
        fused = fused[:B]
    return fused


def encoder_forward(x, prepared, *, block_m=None, out_dtype=jnp.float32):
    """x: (B, input_dim) float32. prepared: output of prepare_params().

    Returns (mu, sigma) for parity with the PyTorch module. The slices are a
    thin view over the fused kernel output; inside a larger jit prefer
    `encoder_forward_fused` and slice at the consumer.
    """
    fused = encoder_forward_fused(x, prepared, block_m=block_m,
                                  out_dtype=out_dtype)
    z_dim = fused.shape[1] // 2
    return fused[:, :z_dim], fused[:, z_dim:]


def init_params(key, input_dim, h_dim, z_dim):
    k1, k2, k3, k4, k5, k6 = jax.random.split(key, 6)
    scale = 0.1
    return {
        "w1": scale * jax.random.normal(k1, (h_dim, input_dim), jnp.float32),
        "b1": scale * jax.random.normal(k2, (h_dim,), jnp.float32),
        "wmu": scale * jax.random.normal(k3, (z_dim, h_dim), jnp.float32),
        "bmu": scale * jax.random.normal(k4, (z_dim,), jnp.float32),
        "wsigma": scale * jax.random.normal(k5, (z_dim, h_dim), jnp.float32),
        "bsigma": scale * jax.random.normal(k6, (z_dim,), jnp.float32),
    }


if __name__ == "__main__":
    key = jax.random.PRNGKey(0)
    k_x, k_p = jax.random.split(key)

    batch, input_dim, h_dim, z_dim = 8, 64, 32, 16
    x = jax.random.normal(k_x, (batch, input_dim), jnp.float32)
    params = init_params(k_p, input_dim, h_dim, z_dim)

    # One-time parameter preparation (transpose + head fusion + bf16 cast).
    prepared = prepare_params(params)

    # Small-batch path (single tile).
    fwd = jax.jit(encoder_forward)
    mu, sigma = fwd(x, prepared)
    jax.block_until_ready((mu, sigma))

    # Pure-JAX f32 reference of the original PyTorch math.
    h_ref = jnp.tanh(x @ params["w1"].T + params["b1"])
    mu_ref = h_ref @ params["wmu"].T + params["bmu"]
    sigma_ref = h_ref @ params["wsigma"].T + params["bsigma"]
    assert mu.shape == (batch, z_dim) and sigma.shape == (batch, z_dim)
    # bf16 matmul operands (f32 accumulation) vs. pure-f32 reference.
    assert jnp.allclose(mu, mu_ref, atol=5e-2, rtol=0.0)
    assert jnp.allclose(sigma, sigma_ref, atol=5e-2, rtol=0.0)

    # Ragged batch + multi-tile ("parallel") path: B=200 not divisible by the
    # tile; wrapper pads to a multiple of block_m and slices the result.
    big_b = 200
    xb = jax.random.normal(k_x, (big_b, input_dim), jnp.float32)
    mu_b, sigma_b = encoder_forward(xb, prepared, block_m=64)
    jax.block_until_ready((mu_b, sigma_b))
    hb_ref = jnp.tanh(xb @ params["w1"].T + params["b1"])
    assert mu_b.shape == (big_b, z_dim) and sigma_b.shape == (big_b, z_dim)
    assert jnp.allclose(mu_b, hb_ref @ params["wmu"].T + params["bmu"],
                        atol=5e-2, rtol=0.0)
    assert jnp.allclose(sigma_b, hb_ref @ params["wsigma"].T + params["bsigma"],
                        atol=5e-2, rtol=0.0)

    # Default tile picker: >= 2 grid steps, fused output consumed directly.
    fused_b = jax.jit(encoder_forward_fused)(xb, prepared)
    jax.block_until_ready(fused_b)
    assert fused_b.shape == (big_b, 2 * z_dim)
    assert jnp.allclose(fused_b[:, :z_dim],
                        hb_ref @ params["wmu"].T + params["bmu"],
                        atol=5e-2, rtol=0.0)

    print("KERNEL_OK")
</pallas_src>

<mosaic_0001>
module attributes {stable_mosaic.version = 11 : i64} {
  func.func @_encoder_kernel(%arg0: i32, %arg1: memref<8x64xf32, #tpu.memory_space<vmem>>, %arg2: memref<64x32xbf16, #tpu.memory_space<vmem>>, %arg3: memref<1x32xf32, #tpu.memory_space<vmem>>, %arg4: memref<32x32xbf16, #tpu.memory_space<vmem>>, %arg5: memref<1x32xf32, #tpu.memory_space<vmem>>, %arg6: memref<8x32xf32, #tpu.memory_space<vmem>>) attributes {dimension_semantics = [#tpu.dimension_semantics<parallel>], iteration_bounds = array<i64: 1>, scalar_prefetch = 0 : i64, scratch_operands = 0 : i64, tpu.core_type = #tpu.core_type<tc>, window_params = [{transform_indices = @transform_0, window_bounds = array<i64: 8, 64>}, {pipeline_mode = #tpu.pipeline_mode<synchronous>, transform_indices = @transform_1, window_bounds = array<i64: 64, 32>}, {pipeline_mode = #tpu.pipeline_mode<synchronous>, transform_indices = @transform_2, window_bounds = array<i64: 1, 32>}, {pipeline_mode = #tpu.pipeline_mode<synchronous>, transform_indices = @transform_3, window_bounds = array<i64: 32, 32>}, {pipeline_mode = #tpu.pipeline_mode<synchronous>, transform_indices = @transform_4, window_bounds = array<i64: 1, 32>}, {transform_indices = @transform_5, window_bounds = array<i64: 8, 32>}]} {
    %c0 = arith.constant 0 : index
    %c0_0 = arith.constant 0 : index
    %0 = vector.load %arg1[%c0, %c0_0] : memref<8x64xf32, #tpu.memory_space<vmem>>, vector<8x64xf32>
    %1 = arith.truncf %0 : vector<8x64xf32> to vector<8x64xbf16>
    %c0_1 = arith.constant 0 : index
    %c0_2 = arith.constant 0 : index
    %2 = vector.load %arg2[%c0_1, %c0_2] : memref<64x32xbf16, #tpu.memory_space<vmem>>, vector<64x32xbf16>
    %cst = arith.constant dense<0.000000e+00> : vector<8x32xf32>
    %3 = tpu.matmul %1, %2, %cst {dimension_numbers = #tpu.dot_dimension_numbers<[1], [0], [0], [1], [0, 0, 1, 1], [], []>} : vector<8x64xbf16>, vector<64x32xbf16>, vector<8x32xf32> -> vector<8x32xf32>
    %c0_3 = arith.constant 0 : index
    %c0_4 = arith.constant 0 : index
    %4 = vector.load %arg3[%c0_3, %c0_4] : memref<1x32xf32, #tpu.memory_space<vmem>>, vector<1x32xf32>
    %5 = vector.broadcast %4 : vector<1x32xf32> to vector<8x32xf32>
    %6 = arith.addf %3, %5 : vector<8x32xf32>
    %7 = math.tanh %6 : vector<8x32xf32>
    %8 = arith.truncf %7 : vector<8x32xf32> to vector<8x32xbf16>
    %c0_5 = arith.constant 0 : index
    %c0_6 = arith.constant 0 : index
    %9 = vector.load %arg4[%c0_5, %c0_6] : memref<32x32xbf16, #tpu.memory_space<vmem>>, vector<32x32xbf16>
    %cst_7 = arith.constant dense<0.000000e+00> : vector<8x32xf32>
    %10 = tpu.matmul %8, %9, %cst_7 {dimension_numbers = #tpu.dot_dimension_numbers<[1], [0], [0], [1], [0, 0, 1, 1], [], []>} : vector<8x32xbf16>, vector<32x32xbf16>, vector<8x32xf32> -> vector<8x32xf32>
    %c0_8 = arith.constant 0 : index
    %c0_9 = arith.constant 0 : index
    %11 = vector.load %arg5[%c0_8, %c0_9] : memref<1x32xf32, #tpu.memory_space<vmem>>, vector<1x32xf32>
    %12 = vector.broadcast %11 : vector<1x32xf32> to vector<8x32xf32>
    %13 = arith.addf %10, %12 : vector<8x32xf32>
    %c0_10 = arith.constant 0 : index
    %c0_11 = arith.constant 0 : index
    %14 = vector.load %arg6[%c0_10, %c0_11] : memref<8x32xf32, #tpu.memory_space<vmem>>, vector<8x32xf32>
    tpu.vector_store %arg6[%c0_10, %c0_11], %13 {strides = array<i32>} : memref<8x32xf32, #tpu.memory_space<vmem>>, vector<8x32xf32>,
    return
  }
  func.func @transform_0(%arg0: i32) -> (i32, i32) {
    %c0_i32 = arith.constant 0 : i32
    %c0_i32_0 = arith.constant 0 : i32
    return %arg0, %c0_i32 : i32, i32
  }
  func.func @transform_1(%arg0: i32) -> (i32, i32) {
    %c0_i32 = arith.constant 0 : i32
    %c0_i32_0 = arith.constant 0 : i32
    %c0_i32_1 = arith.constant 0 : i32
    return %c0_i32, %c0_i32_0 : i32, i32
  }
  func.func @transform_2(%arg0: i32) -> (i32, i32) {
    %c0_i32 = arith.constant 0 : i32
    %c0_i32_0 = arith.constant 0 : i32
    %c0_i32_1 = arith.constant 0 : i32
    return %c0_i32, %c0_i32_0 : i32, i32
  }
  func.func @transform_3(%arg0: i32) -> (i32, i32) {
    %c0_i32 = arith.constant 0 : i32
    %c0_i32_0 = arith.constant 0 : i32
    %c0_i32_1 = arith.constant 0 : i32
    return %c0_i32, %c0_i32_0 : i32, i32
  }
  func.func @transform_4(%arg0: i32) -> (i32, i32) {
    %c0_i32 = arith.constant 0 : i32
    %c0_i32_0 = arith.constant 0 : i32
    %c0_i32_1 = arith.constant 0 : i32
    return %c0_i32, %c0_i32_0 : i32, i32
  }
  func.func @transform_5(%arg0: i32) -> (i32, i32) {
    %c0_i32 = arith.constant 0 : i32
    %c0_i32_0 = arith.constant 0 : i32
    return %arg0, %c0_i32 : i32, i32
  }
}

</mosaic_0001>

<bundles_post_ra>
// kernel: encoder_forward.1
= control target key start
LH: loop header
LB: loop body
LE: loop exit
PB: predicated region body
PF: predicated region fallthrough
CT: control target
= control target key end

     0   :  { %vm59_vm0 = vcmask 523264   ;;  %vm98_vm1 = vcmask 261120   ;;  %s216_s1 = inlined_call_operand.vmem [shape: bf16[64,32], index: 1, kind: input, shape index: {}]   ;;  %s217_s2 = inlined_call_operand.vmem [shape: f32[1,32], index: 2, kind: input, shape index: {}]   ;;  %s218_s0 = inlined_call_operand.vmem [shape: f32[8,64], index: 0, kind: input, shape index: {}]   ;;  %s219_s4 = inlined_call_operand.vmem [shape: f32[1,32], index: 4, kind: input, shape index: {}]   ;;  %s220_s3 = inlined_call_operand.vmem [shape: bf16[32,32], index: 3, kind: input, shape index: {}]   ;;  %s221_s5 = inlined_call_operand.vmem [shape: f32[8,32], index: 5, kind: output, shape index: {}]  }
   0x1   :  { %v149_v0 = vld [vmem:[%s216_s1 + $0x18] sm:$0xff]  ;;  %v148_v1 = vld [vmem:[%s216_s1 + $0x10] sm:$0xff]  ;;  %v147_v2 = vld [vmem:[%s216_s1 + $0x8] sm:$0xff] }
   0x2   :  { %67 = vmatpush.bf16.msra.mxu0 %v149_v0  ;;  %v146_v3 = vld [vmem:[%s216_s1] sm:$0xff]  ;;  %v151_v6 = vld [vmem:[%s220_s3 + $0x8] sm:$0xff] }
   0x3   :  { %v21_v4 = vld [vmem:[%s218_s0] sm:$0xff]  ;;  %108 = vmatpush.bf16.msra.mxu1 %v151_v6 }
   0x4   :  { %v22_v5 = vpack.c.bf16 %v21_v4, %v21_v4  ;;  %v150_v7 = vld [vmem:[%s220_s3] sm:$0xff] }
   0x5   :  { %v152_v8 = vld [vmem:[%s217_s2] ss:$0 sm:$0xff] }
   0x6   :  { %68 = vmatpush.bf16.msra.mxu0 %v148_v1  ;;  %v153_v14 = vld [vmem:[%s219_s4] ss:$0 sm:$0xff] }
   0x7   :  { %109 = vmatpush.bf16.msra.mxu1 %v150_v7 }
   0xa   :  { %69 = vmatpush.bf16.msra.mxu0 %v147_v2 }
   0xe   :  { %70 = vmatpush.bf16.msra.mxu0 %v146_v3 }
  0x11   :  { %136 = vmatmul.msk.bf16.vlgmr.msra.gmra.mxu0 %vm59_vm0, %v22_v5 }
  0x8e   :  { %v72_v9 = vpop.f32.mrf.mxu0 }
  0x8f   :  { %v73_v10 = vadd.f32 %v152_v8, %v72_v9 }
  0x91   :  { %154 = vtanh.f32 %v73_v10 }
  0x96   :  { %v74_v11 = vpop.f32.mrf.mxu0 }
  0x97   :  { %v155_v12 = vpop.eup %154 }
  0x98   :  { %v77_v13 = vpack.c.bf16 %v155_v12, %v155_v12 }
  0x9a   :  { %145 = vmatmul.msk.bf16.vlgmr.msra.gmra.mxu1 %vm98_vm1, %v77_v13 }
 0x117   :  { %v111_v15 = vpop.f32.mrf.mxu1 }
 0x118   :  { %v112_v16 = vadd.f32 %v153_v14, %v111_v15 }
 0x11a   :  { %115 = vst.msk [vmem:[%s221_s5] sm:$0xff] %vm98_vm1, %v112_v16 }
 0x11f   :  { %v113_v17 = vpop.f32.mrf.mxu1 }

</bundles_post_ra>
